<compile_context>
chip_gen: v5e
topology: v5e:2x2
jax: 0.10.0
libtpu: 0.0.40
codegen_flags: <defaults>
</compile_context>

<pallas_src>
import functools

import jax
import jax.numpy as jnp
from jax.experimental import pallas as pl
from jax.experimental.pallas import tpu as pltpu


def _round_up(x, m):
    return ((x + m - 1) // m) * m


def qnet_kernel(x_ref, w1_ref, b1_ref, w2_ref, b2_ref, w3_ref, b3_ref, o_ref):
    """Fused 3-layer MLP forward for one batch tile.

    x_ref : (TB, D_in)  bf16 batch tile
    w1    : (D_in, H)   bf16     b1 : (1, H)  f32
    w2    : (H, H)      bf16     b2 : (1, H)  f32
    w3    : (H, O_pad)  bf16     b3 : (1, O_pad) f32
    o_ref : (TB, O_pad) f32
    """
    x = x_ref[...]
    # Layer 1: bf16 matmul, f32 accumulate, bias + ReLU in f32.
    h1 = jnp.dot(x, w1_ref[...], preferred_element_type=jnp.float32) + b1_ref[...]
    h1 = jnp.maximum(h1, 0.0).astype(jnp.bfloat16)
    # Layer 2.
    h2 = jnp.dot(h1, w2_ref[...], preferred_element_type=jnp.float32) + b2_ref[...]
    h2 = jnp.maximum(h2, 0.0).astype(jnp.bfloat16)
    # Layer 3 (no activation).
    out = jnp.dot(h2, w3_ref[...], preferred_element_type=jnp.float32) + b3_ref[...]
    o_ref[...] = out.astype(o_ref.dtype)


@functools.partial(jax.jit, static_argnames=("tile_b",))
def qnetwork_forward(x, params, tile_b=256):
    """x: (B, input_dim + action_dim) float32. Returns (B, output_dim) float32."""
    w1, b1, w2, b2, w3, b3 = params
    B, D_in = x.shape
    H = w1.shape[1]
    O = w3.shape[1]

    # --- lane-dense output: pad final layer to a multiple of 128 columns ---
    O_pad = max(_round_up(O, 128), 128)
    if O_pad != O:
        w3 = jnp.pad(w3, ((0, 0), (0, O_pad - O)))
        b3 = jnp.pad(b3, ((0, 0), (0, O_pad - O)))

    # --- bf16 operands for the MXU; biases stay f32 (added to f32 accumulator) ---
    xb = x.astype(jnp.bfloat16)
    w1b = w1.astype(jnp.bfloat16)
    w2b = w2.astype(jnp.bfloat16)
    w3b = w3.astype(jnp.bfloat16)
    b1f = b1.astype(jnp.float32)
    b2f = b2.astype(jnp.float32)
    b3f = b3.astype(jnp.float32)

    # --- batch tiling: large MXU-friendly tiles; pad tail rows with zeros ---
    # Small batches (B <= tile_b) become a single grid step covering the batch.
    tile = min(tile_b, _round_up(B, 8))
    B_pad = _round_up(B, tile)
    if B_pad != B:
        xb = jnp.pad(xb, ((0, B_pad - B), (0, 0)))

    grid = (B_pad // tile,)

    # Advisory cost estimate for the XLA scheduler.
    flops = 2 * B_pad * (D_in * H + H * H + H * O_pad)
    bytes_accessed = (
        B_pad * D_in * 2                                   # bf16 x in
        + B_pad * O_pad * 4                                # f32 out
        + (D_in * H + H * H + H * O_pad) * 2               # bf16 weights
        + (2 * H + O_pad) * 4                              # f32 biases
    )
    cost = pl.CostEstimate(flops=flops, transcendentals=0,
                           bytes_accessed=bytes_accessed)

    full = lambda i: (0, 0)  # weights/biases: single VMEM-resident block

    out = pl.pallas_call(
        qnet_kernel,
        out_shape=jax.ShapeDtypeStruct((B_pad, O_pad), jnp.float32),
        grid_spec=pltpu.PrefetchScalarGridSpec(
            num_scalar_prefetch=0,
            grid=grid,
            in_specs=[
                pl.BlockSpec((tile, D_in), lambda i: (i, 0)),  # x tile
                pl.BlockSpec((D_in, H), full),                 # w1
                pl.BlockSpec((1, H), full),                    # b1
                pl.BlockSpec((H, H), full),                    # w2
                pl.BlockSpec((1, H), full),                    # b2
                pl.BlockSpec((H, O_pad), full),                # w3 (lane-padded)
                pl.BlockSpec((1, O_pad), full),                # b3 (lane-padded)
            ],
            out_specs=pl.BlockSpec((tile, O_pad), lambda i: (i, 0)),
        ),
        compiler_params=pltpu.CompilerParams(
            dimension_semantics=("parallel",),  # shard batch tiles across TCs (v7x)
        ),
        cost_estimate=cost,
    )(xb, w1b, b1f, w2b, b2f, w3b, b3f)

    # Strip batch padding and the lane-padding of the output layer.
    return out[:B, :O]


def init_qnetwork_params(key, input_dim, action_dim, hidden_dim, output_dim):
    """Matches nn.Linear default init U(-1/sqrt(fan_in), +1/sqrt(fan_in))."""
    d0 = input_dim + action_dim
    sizes = [(d0, hidden_dim), (hidden_dim, hidden_dim), (hidden_dim, output_dim)]
    params = []
    for fan_in, fan_out in sizes:
        key, kw, kb = jax.random.split(key, 3)
        bound = 1.0 / jnp.sqrt(fan_in)
        w = jax.random.uniform(kw, (fan_in, fan_out), jnp.float32, -bound, bound)
        b = jax.random.uniform(kb, (1, fan_out), jnp.float32, -bound, bound)
        params.extend([w, b])
    return tuple(params)


def qnetwork_ref(x, params):
    """Pure-JAX f32 reference for correctness checking."""
    w1, b1, w2, b2, w3, b3 = params
    h1 = jnp.maximum(x @ w1 + b1, 0.0)
    h2 = jnp.maximum(h1 @ w2 + b2, 0.0)
    return h2 @ w3 + b3


if __name__ == "__main__":
    # Small demo shapes consistent with QNetwork(input_dim, action_dim, hidden_dim, output_dim=1).
    input_dim, action_dim, hidden_dim, output_dim = 126, 2, 128, 1

    key = jax.random.PRNGKey(0)
    key, kx1, kx2 = jax.random.split(key, 3)
    params = init_qnetwork_params(key, input_dim, action_dim, hidden_dim, output_dim)

    # Case 1: batch fits a single aligned tile.
    x1 = jax.random.normal(kx1, (64, input_dim + action_dim), jnp.float32)
    out1 = jax.block_until_ready(qnetwork_forward(x1, params))
    ref1 = qnetwork_ref(x1, params)
    assert out1.shape == (64, output_dim), out1.shape
    assert jnp.allclose(out1, ref1, atol=2e-2, rtol=2e-2), "mismatch vs reference (case 1)"

    # Case 2: batch not a multiple of 8 -> exercises wrapper-side tail padding.
    x2 = jax.random.normal(kx2, (50, input_dim + action_dim), jnp.float32)
    out2 = jax.block_until_ready(qnetwork_forward(x2, params))
    ref2 = qnetwork_ref(x2, params)
    assert out2.shape == (50, output_dim), out2.shape
    assert jnp.allclose(out2, ref2, atol=2e-2, rtol=2e-2), "mismatch vs reference (case 2)"

    print("KERNEL_OK")
</pallas_src>

<mosaic_0001>
module attributes {stable_mosaic.version = 11 : i64} {
  func.func @qnet_kernel(%arg0: i32, %arg1: memref<64x128xbf16, #tpu.memory_space<vmem>>, %arg2: memref<128x128xbf16, #tpu.memory_space<vmem>>, %arg3: memref<1x128xf32, #tpu.memory_space<vmem>>, %arg4: memref<128x128xbf16, #tpu.memory_space<vmem>>, %arg5: memref<1x128xf32, #tpu.memory_space<vmem>>, %arg6: memref<128x128xbf16, #tpu.memory_space<vmem>>, %arg7: memref<1x128xf32, #tpu.memory_space<vmem>>, %arg8: memref<64x128xf32, #tpu.memory_space<vmem>>) attributes {dimension_semantics = [#tpu.dimension_semantics<parallel>], iteration_bounds = array<i64: 1>, scalar_prefetch = 0 : i64, scratch_operands = 0 : i64, tpu.core_type = #tpu.core_type<tc>, window_params = [{transform_indices = @transform_0, window_bounds = array<i64: 64, 128>}, {pipeline_mode = #tpu.pipeline_mode<synchronous>, transform_indices = @transform_1, window_bounds = array<i64: 128, 128>}, {pipeline_mode = #tpu.pipeline_mode<synchronous>, transform_indices = @transform_2, window_bounds = array<i64: 1, 128>}, {pipeline_mode = #tpu.pipeline_mode<synchronous>, transform_indices = @transform_3, window_bounds = array<i64: 128, 128>}, {pipeline_mode = #tpu.pipeline_mode<synchronous>, transform_indices = @transform_4, window_bounds = array<i64: 1, 128>}, {pipeline_mode = #tpu.pipeline_mode<synchronous>, transform_indices = @transform_5, window_bounds = array<i64: 128, 128>}, {pipeline_mode = #tpu.pipeline_mode<synchronous>, transform_indices = @transform_6, window_bounds = array<i64: 1, 128>}, {transform_indices = @transform_7, window_bounds = array<i64: 64, 128>}]} {
    %c0 = arith.constant 0 : index
    %c0_0 = arith.constant 0 : index
    %0 = vector.load %arg1[%c0, %c0_0] : memref<64x128xbf16, #tpu.memory_space<vmem>>, vector<64x128xbf16>
    %c0_1 = arith.constant 0 : index
    %c0_2 = arith.constant 0 : index
    %1 = vector.load %arg2[%c0_1, %c0_2] : memref<128x128xbf16, #tpu.memory_space<vmem>>, vector<128x128xbf16>
    %cst = arith.constant dense<0.000000e+00> : vector<64x128xf32>
    %2 = tpu.matmul %0, %1, %cst {dimension_numbers = #tpu.dot_dimension_numbers<[1], [0], [0], [1], [0, 0, 1, 1], [], []>} : vector<64x128xbf16>, vector<128x128xbf16>, vector<64x128xf32> -> vector<64x128xf32>
    %c0_3 = arith.constant 0 : index
    %c0_4 = arith.constant 0 : index
    %3 = vector.load %arg3[%c0_3, %c0_4] : memref<1x128xf32, #tpu.memory_space<vmem>>, vector<1x128xf32>
    %4 = vector.broadcast %3 : vector<1x128xf32> to vector<64x128xf32>
    %5 = arith.addf %2, %4 : vector<64x128xf32>
    %cst_5 = arith.constant 0.000000e+00 : f32
    %6 = vector.broadcast %cst_5 : f32 to vector<64x128xf32>
    %7 = arith.maximumf %5, %6 : vector<64x128xf32>
    %8 = arith.truncf %7 : vector<64x128xf32> to vector<64x128xbf16>
    %c0_6 = arith.constant 0 : index
    %c0_7 = arith.constant 0 : index
    %9 = vector.load %arg4[%c0_6, %c0_7] : memref<128x128xbf16, #tpu.memory_space<vmem>>, vector<128x128xbf16>
    %cst_8 = arith.constant dense<0.000000e+00> : vector<64x128xf32>
    %10 = tpu.matmul %8, %9, %cst_8 {dimension_numbers = #tpu.dot_dimension_numbers<[1], [0], [0], [1], [0, 0, 1, 1], [], []>} : vector<64x128xbf16>, vector<128x128xbf16>, vector<64x128xf32> -> vector<64x128xf32>
    %c0_9 = arith.constant 0 : index
    %c0_10 = arith.constant 0 : index
    %11 = vector.load %arg5[%c0_9, %c0_10] : memref<1x128xf32, #tpu.memory_space<vmem>>, vector<1x128xf32>
    %12 = vector.broadcast %11 : vector<1x128xf32> to vector<64x128xf32>
    %13 = arith.addf %10, %12 : vector<64x128xf32>
    %cst_11 = arith.constant 0.000000e+00 : f32
    %14 = vector.broadcast %cst_11 : f32 to vector<64x128xf32>
    %15 = arith.maximumf %13, %14 : vector<64x128xf32>
    %16 = arith.truncf %15 : vector<64x128xf32> to vector<64x128xbf16>
    %c0_12 = arith.constant 0 : index
    %c0_13 = arith.constant 0 : index
    %17 = vector.load %arg6[%c0_12, %c0_13] : memref<128x128xbf16, #tpu.memory_space<vmem>>, vector<128x128xbf16>
    %cst_14 = arith.constant dense<0.000000e+00> : vector<64x128xf32>
    %18 = tpu.matmul %16, %17, %cst_14 {dimension_numbers = #tpu.dot_dimension_numbers<[1], [0], [0], [1], [0, 0, 1, 1], [], []>} : vector<64x128xbf16>, vector<128x128xbf16>, vector<64x128xf32> -> vector<64x128xf32>
    %c0_15 = arith.constant 0 : index
    %c0_16 = arith.constant 0 : index
    %19 = vector.load %arg7[%c0_15, %c0_16] : memref<1x128xf32, #tpu.memory_space<vmem>>, vector<1x128xf32>
    %20 = vector.broadcast %19 : vector<1x128xf32> to vector<64x128xf32>
    %21 = arith.addf %18, %20 : vector<64x128xf32>
    %c0_17 = arith.constant 0 : index
    %c0_18 = arith.constant 0 : index
    %22 = vector.load %arg8[%c0_17, %c0_18] : memref<64x128xf32, #tpu.memory_space<vmem>>, vector<64x128xf32>
    tpu.vector_store %arg8[%c0_17, %c0_18], %21 {strides = array<i32>} : memref<64x128xf32, #tpu.memory_space<vmem>>, vector<64x128xf32>,
    return
  }
  func.func @transform_0(%arg0: i32) -> (i32, i32) {
    %c0_i32 = arith.constant 0 : i32
    %c0_i32_0 = arith.constant 0 : i32
    return %arg0, %c0_i32 : i32, i32
  }
  func.func @transform_1(%arg0: i32) -> (i32, i32) {
    %c0_i32 = arith.constant 0 : i32
    %c0_i32_0 = arith.constant 0 : i32
    %c0_i32_1 = arith.constant 0 : i32
    return %c0_i32, %c0_i32_0 : i32, i32
  }
  func.func @transform_2(%arg0: i32) -> (i32, i32) {
    %c0_i32 = arith.constant 0 : i32
    %c0_i32_0 = arith.constant 0 : i32
    %c0_i32_1 = arith.constant 0 : i32
    return %c0_i32, %c0_i32_0 : i32, i32
  }
  func.func @transform_3(%arg0: i32) -> (i32, i32) {
    %c0_i32 = arith.constant 0 : i32
    %c0_i32_0 = arith.constant 0 : i32
    %c0_i32_1 = arith.constant 0 : i32
    return %c0_i32, %c0_i32_0 : i32, i32
  }
  func.func @transform_4(%arg0: i32) -> (i32, i32) {
    %c0_i32 = arith.constant 0 : i32
    %c0_i32_0 = arith.constant 0 : i32
    %c0_i32_1 = arith.constant 0 : i32
    return %c0_i32, %c0_i32_0 : i32, i32
  }
  func.func @transform_5(%arg0: i32) -> (i32, i32) {
    %c0_i32 = arith.constant 0 : i32
    %c0_i32_0 = arith.constant 0 : i32
    %c0_i32_1 = arith.constant 0 : i32
    return %c0_i32, %c0_i32_0 : i32, i32
  }
  func.func @transform_6(%arg0: i32) -> (i32, i32) {
    %c0_i32 = arith.constant 0 : i32
    %c0_i32_0 = arith.constant 0 : i32
    %c0_i32_1 = arith.constant 0 : i32
    return %c0_i32, %c0_i32_0 : i32, i32
  }
  func.func @transform_7(%arg0: i32) -> (i32, i32) {
    %c0_i32 = arith.constant 0 : i32
    %c0_i32_0 = arith.constant 0 : i32
    return %arg0, %c0_i32 : i32, i32
  }
}

</mosaic_0001>

<bundles_post_ra>
// kernel: qnetwork_forward.1
= control target key start
LH: loop header
LB: loop body
LE: loop exit
PB: predicated region body
PF: predicated region fallthrough
CT: control target
= control target key end

     0   :  { %s693_s1 = inlined_call_operand.vmem [shape: bf16[128,128], index: 1, kind: input, shape index: {}]   ;;  %s694_s2 = inlined_call_operand.vmem [shape: f32[1,128], index: 2, kind: input, shape index: {}]   ;;  %s695_s0 = inlined_call_operand.vmem [shape: bf16[64,128], index: 0, kind: input, shape index: {}]   ;;  %s696_s3 = inlined_call_operand.vmem [shape: bf16[128,128], index: 3, kind: input, shape index: {}]   ;;  %s697_s4 = inlined_call_operand.vmem [shape: f32[1,128], index: 4, kind: input, shape index: {}]   ;;  %s698_s5 = inlined_call_operand.vmem [shape: bf16[128,128], index: 5, kind: input, shape index: {}]   ;;  %s699_s6 = inlined_call_operand.vmem [shape: f32[1,128], index: 6, kind: input, shape index: {}]   ;;  %s700_s7 = inlined_call_operand.vmem [shape: f32[64,128], index: 7, kind: output, shape index: {}]  }
   0x1   :  { %v508_v0 = vld [vmem:[%s693_s1 + $0x38] sm:$0xff]  ;;  %v507_v1 = vld [vmem:[%s693_s1 + $0x30] sm:$0xff]  ;;  %v506_v2 = vld [vmem:[%s693_s1 + $0x28] sm:$0xff] }
   0x2   :  { %126 = vmatpush.bf16.msra.mxu0 %v508_v0  ;;  %525 = vmatpush.bf16.msra.mxu3 %v508_v0  ;;  %v505_v3 = vld [vmem:[%s693_s1 + $0x20] sm:$0xff]  ;;  %v504_v4 = vld [vmem:[%s693_s1 + $0x18] sm:$0xff]  ;;  %v503_v5 = vld [vmem:[%s693_s1 + $0x10] sm:$0xff] }
   0x3   :  { %v502_v6 = vld [vmem:[%s693_s1 + $0x8] sm:$0xff]  ;;  %v501_v7 = vld [vmem:[%s693_s1] sm:$0xff]  ;;  %v516_v10 = vld [vmem:[%s696_s3 + $0x38] sm:$0xff] }
   0x4   :  { %v497_v8 = vld [vmem:[%s695_s0] sm:$0xff]  ;;  %v498_v9 = vld [vmem:[%s695_s0 + $0x8] sm:$0xff]  ;;  %235 = vmatpush.bf16.msra.mxu1 %v516_v10  ;;  %v515_v11 = vld [vmem:[%s696_s3 + $0x30] sm:$0xff] }
   0x5   :  { %v514_v12 = vld [vmem:[%s696_s3 + $0x28] sm:$0xff]  ;;  %v513_v13 = vld [vmem:[%s696_s3 + $0x20] sm:$0xff]  ;;  %v499_v14 = vld [vmem:[%s695_s0 + $0x10] sm:$0xff] }
   0x6   :  { %127 = vmatpush.bf16.msra.mxu0 %v507_v1  ;;  %526 = vmatpush.bf16.msra.mxu3 %v507_v1  ;;  %v500_v15 = vld [vmem:[%s695_s0 + $0x18] sm:$0xff]  ;;  %v511_v17 = vld [vmem:[%s696_s3 + $0x10] sm:$0xff]  ;;  %v510_v18 = vld [vmem:[%s696_s3 + $0x8] sm:$0xff] }
   0x7   :  { %v512_v16 = vld [vmem:[%s696_s3 + $0x18] sm:$0xff]  ;;  %v509_v19 = vld [vmem:[%s696_s3] sm:$0xff]  ;;  %v523_v38 = vld [vmem:[%s698_s5 + $0x30] sm:$0xff] }
   0x8   :  { %236 = vmatpush.bf16.msra.mxu1 %v515_v11  ;;  %v533_v21 = vld [vmem:[%s694_s2] ss:$0 sm:$0xff]  ;;  %v524_v37 = vld [vmem:[%s698_s5 + $0x38] sm:$0xff]  ;;  %v522_v41 = vld [vmem:[%s698_s5 + $0x28] sm:$0xff] }
   0x9   :  { %344 = vmatpush.bf16.msra.mxu2 %v524_v37  ;;  %v521_v45 = vld [vmem:[%s698_s5 + $0x20] sm:$0xff]  ;;  %v520_v53 = vld [vmem:[%s698_s5 + $0x18] sm:$0xff]  ;;  %v519_v54 = vld [vmem:[%s698_s5 + $0x10] sm:$0xff] }
   0xa   :  { %128 = vmatpush.bf16.msra.mxu0 %v506_v2  ;;  %527 = vmatpush.bf16.msra.mxu3 %v506_v2  ;;  %v518_v55 = vld [vmem:[%s698_s5 + $0x8] sm:$0xff]  ;;  %v517_v56 = vld [vmem:[%s698_s5] sm:$0xff] }
   0xb   :  { %v534_v58 = vld [vmem:[%s697_s4] ss:$0 sm:$0xff] }
   0xc   :  { %237 = vmatpush.bf16.msra.mxu1 %v514_v12 }
   0xd   :  { %345 = vmatpush.bf16.msra.mxu2 %v523_v38 }
   0xe   :  { %129 = vmatpush.bf16.msra.mxu0 %v505_v3  ;;  %528 = vmatpush.bf16.msra.mxu3 %v505_v3 }
  0x10   :  { %238 = vmatpush.bf16.msra.mxu1 %v513_v13 }
  0x11   :  { %346 = vmatpush.bf16.msra.mxu2 %v522_v41 }
  0x12   :  { %130 = vmatpush.bf16.msra.mxu0 %v504_v4  ;;  %529 = vmatpush.bf16.msra.mxu3 %v504_v4 }
  0x14   :  { %239 = vmatpush.bf16.msra.mxu1 %v512_v16 }
  0x15   :  { %347 = vmatpush.bf16.msra.mxu2 %v521_v45 }
  0x16   :  { %131 = vmatpush.bf16.msra.mxu0 %v503_v5  ;;  %530 = vmatpush.bf16.msra.mxu3 %v503_v5 }
  0x18   :  { %240 = vmatpush.bf16.msra.mxu1 %v511_v17 }
  0x19   :  { %348 = vmatpush.bf16.msra.mxu2 %v520_v53 }
  0x1a   :  { %132 = vmatpush.bf16.msra.mxu0 %v502_v6  ;;  %531 = vmatpush.bf16.msra.mxu3 %v502_v6 }
  0x1c   :  { %241 = vmatpush.bf16.msra.mxu1 %v510_v18 }
  0x1d   :  { %349 = vmatpush.bf16.msra.mxu2 %v519_v54 }
  0x1e   :  { %133 = vmatpush.bf16.msra.mxu0 %v501_v7  ;;  %532 = vmatpush.bf16.msra.mxu3 %v501_v7 }
  0x20   :  { %242 = vmatpush.bf16.msra.mxu1 %v509_v19 }
  0x21   :  { %134 = vmatmul.bf16.vlgmr.msra.gmra.mxu0 %v497_v8  ;;  %139 = vmatmul.bf16.vlgmr.msra.gmra.mxu3 %v498_v9 }
  0x22   :  { %350 = vmatpush.bf16.msra.mxu2 %v518_v55 }
  0x26   :  { %351 = vmatpush.bf16.msra.mxu2 %v517_v56 }
  0x31   :  { %144 = vmatmul.bf16.gmra.mxu3 %v499_v14 }
  0x41   :  { %149 = vmatmul.bf16.gmra.mxu3 %v500_v15 }
  0x9e   :  { %v135_v20 = vpop.f32.mrf.mxu0 }
  0x9f   :  { %v136_v23 = vadd.f32 %v533_v21, %v135_v20 }
  0xa1   :  { %v155_v26 = vmax.f32 %v136_v23, 0.0 }
  0xa4   :  { %v140_v22 = vpop.f32.mrf.mxu3 }
  0xa5   :  { %v141_v30 = vadd.f32 %v533_v21, %v140_v22  ;;  %v535_v22 = vld [vmem:[%s699_s6] ss:$0 sm:$0xff] }
  0xa6   :  { %v137_v24 = vpop.f32.mrf.mxu0 }
  0xa7   :  { %v138_v25 = vadd.f32 %v533_v21, %v137_v24  ;;  %v157_v33 = vmax.f32 %v141_v30, 0.0 }
  0xa9   :  { %v156_v27 = vmax.f32 %v138_v25, 0.0 }
  0xab   :  { %v163_v28 = vpack.c.bf16 %v156_v27, %v155_v26 }
  0xac   :  { %v142_v29 = vpop.f32.mrf.mxu3 }
  0xad   :  { %243 = vmatmul.bf16.vlgmr.msra.gmra.mxu1 %v163_v28  ;;  %v143_v31 = vadd.f32 %v533_v21, %v142_v29 }
  0xaf   :  { %v158_v34 = vmax.f32 %v143_v31, 0.0 }
  0xb1   :  { %v164_v35 = vpack.c.bf16 %v158_v34, %v157_v33 }
  0xb4   :  { %v145_v32 = vpop.f32.mrf.mxu3 }
  0xb5   :  { %v146_v39 = vadd.f32 %v533_v21, %v145_v32 }
  0xb7   :  { %v159_v43 = vmax.f32 %v146_v39, 0.0 }
  0xbc   :  { %v147_v36 = vpop.f32.mrf.mxu3 }
  0xbd   :  { %248 = vmatmul.bf16.gmra.mxu1 %v164_v35  ;;  %v148_v40 = vadd.f32 %v533_v21, %v147_v36 }
  0xbf   :  { %v160_v44 = vmax.f32 %v148_v40, 0.0 }
  0xc1   :  { %v165_v46 = vpack.c.bf16 %v160_v44, %v159_v43 }
  0xc4   :  { %v150_v42 = vpop.f32.mrf.mxu3 }
  0xc5   :  { %v151_v48 = vadd.f32 %v533_v21, %v150_v42 }
  0xc7   :  { %v161_v50 = vmax.f32 %v151_v48, 0.0 }
  0xcc   :  { %v152_v47 = vpop.f32.mrf.mxu3 }
  0xcd   :  { %253 = vmatmul.bf16.gmra.mxu1 %v165_v46  ;;  %v153_v49 = vadd.f32 %v533_v21, %v152_v47 }
  0xcf   :  { %v162_v51 = vmax.f32 %v153_v49, 0.0 }
  0xd1   :  { %v166_v52 = vpack.c.bf16 %v162_v51, %v161_v50 }
  0xdd   :  { %258 = vmatmul.bf16.gmra.mxu1 %v166_v52 }
 0x12a   :  { %v244_v57 = vpop.f32.mrf.mxu1 }
 0x12b   :  { %v245_v59 = vadd.f32 %v534_v58, %v244_v57 }
 0x12d   :  { %v264_v62 = vmax.f32 %v245_v59, 0.0 }
 0x132   :  { %v246_v60 = vpop.f32.mrf.mxu1 }
 0x133   :  { %v247_v61 = vadd.f32 %v534_v58, %v246_v60 }
 0x135   :  { %v265_v63 = vmax.f32 %v247_v61, 0.0 }
 0x137   :  { %v272_v0 = vpack.c.bf16 %v265_v63, %v264_v62 }
 0x139   :  { %352 = vmatmul.bf16.vlgmr.msra.gmra.mxu2 %v272_v0 }
 0x13a   :  { %v249_v1 = vpop.f32.mrf.mxu1 }
 0x13b   :  { %v250_v2 = vadd.f32 %v534_v58, %v249_v1 }
 0x13d   :  { %v266_v5 = vmax.f32 %v250_v2, 0.0 }
 0x142   :  { %v251_v3 = vpop.f32.mrf.mxu1 }
 0x143   :  { %v252_v4 = vadd.f32 %v534_v58, %v251_v3 }
 0x145   :  { %v267_v6 = vmax.f32 %v252_v4, 0.0 }
 0x147   :  { %v273_v7 = vpack.c.bf16 %v267_v6, %v266_v5 }
 0x149   :  { %357 = vmatmul.bf16.gmra.mxu2 %v273_v7 }
 0x14a   :  { %v254_v8 = vpop.f32.mrf.mxu1 }
 0x14b   :  { %v255_v9 = vadd.f32 %v534_v58, %v254_v8 }
 0x14d   :  { %v268_v12 = vmax.f32 %v255_v9, 0.0 }
 0x152   :  { %v256_v10 = vpop.f32.mrf.mxu1 }
 0x153   :  { %v257_v11 = vadd.f32 %v534_v58, %v256_v10 }
 0x155   :  { %v269_v13 = vmax.f32 %v257_v11, 0.0 }
 0x157   :  { %v274_v14 = vpack.c.bf16 %v269_v13, %v268_v12 }
 0x159   :  { %362 = vmatmul.bf16.gmra.mxu2 %v274_v14 }
 0x15a   :  { %v259_v15 = vpop.f32.mrf.mxu1 }
 0x15b   :  { %v260_v16 = vadd.f32 %v534_v58, %v259_v15 }
 0x15d   :  { %v270_v19 = vmax.f32 %v260_v16, 0.0 }
 0x162   :  { %v261_v17 = vpop.f32.mrf.mxu1 }
 0x163   :  { %v262_v18 = vadd.f32 %v534_v58, %v261_v17 }
 0x165   :  { %v271_v20 = vmax.f32 %v262_v18, 0.0 }
 0x167   :  { %v275_v21 = vpack.c.bf16 %v271_v20, %v270_v19 }
 0x169   :  { %367 = vmatmul.bf16.gmra.mxu2 %v275_v21 }
 0x1bc   :  { %v353_v23 = vpop.f32.mrf.mxu2 }
 0x1bd   :  { %v354_v24 = vadd.f32 %v535_v22, %v353_v23 }
 0x1bf   :  { %373 = vst [vmem:[%s700_s7] sm:$0xff] %v354_v24 }
 0x1c4   :  { %v355_v25 = vpop.f32.mrf.mxu2 }
 0x1c5   :  { %v356_v26 = vadd.f32 %v535_v22, %v355_v25 }
 0x1c7   :  { %374 = vst [vmem:[%s700_s7 + $0x8] sm:$0xff] %v356_v26 }
 0x1cc   :  { %v358_v27 = vpop.f32.mrf.mxu2 }
 0x1cd   :  { %v359_v28 = vadd.f32 %v535_v22, %v358_v27 }
 0x1cf   :  { %375 = vst [vmem:[%s700_s7 + $0x10] sm:$0xff] %v359_v28 }
 0x1d4   :  { %v360_v29 = vpop.f32.mrf.mxu2 }
 0x1d5   :  { %v361_v30 = vadd.f32 %v535_v22, %v360_v29 }
 0x1d7   :  { %376 = vst [vmem:[%s700_s7 + $0x18] sm:$0xff] %v361_v30 }
 0x1dc   :  { %v363_v31 = vpop.f32.mrf.mxu2 }
 0x1dd   :  { %v364_v32 = vadd.f32 %v535_v22, %v363_v31 }
 0x1df   :  { %377 = vst [vmem:[%s700_s7 + $0x20] sm:$0xff] %v364_v32 }
 0x1e4   :  { %v365_v33 = vpop.f32.mrf.mxu2 }
 0x1e5   :  { %v366_v34 = vadd.f32 %v535_v22, %v365_v33 }
 0x1e7   :  { %378 = vst [vmem:[%s700_s7 + $0x28] sm:$0xff] %v366_v34 }
 0x1ec   :  { %v368_v35 = vpop.f32.mrf.mxu2 }
 0x1ed   :  { %v369_v36 = vadd.f32 %v535_v22, %v368_v35 }
 0x1ef   :  { %379 = vst [vmem:[%s700_s7 + $0x30] sm:$0xff] %v369_v36 }
 0x1f4   :  { %v370_v37 = vpop.f32.mrf.mxu2 }
 0x1f5   :  { %v371_v38 = vadd.f32 %v535_v22, %v370_v37 }
 0x1f7   :  { %380 = vst [vmem:[%s700_s7 + $0x38] sm:$0xff] %v371_v38 }

</bundles_post_ra>
